<compile_context>
chip_gen: v5e
topology: v5e:2x2
jax: 0.10.0
libtpu: 0.0.40
codegen_flags: <defaults>
</compile_context>

<pallas_src>
import functools

import jax
import jax.numpy as jnp
from jax.experimental import pallas as pl
from jax.experimental.pallas import tpu as pltpu

_LANE = 128
_SUBLANE = 8


def _round_up(n: int, m: int) -> int:
    return ((n + m - 1) // m) * m


def _mpl_fused_kernel(*refs, n_layers: int):
    """refs = (x_ref, w0_ref, b0_ref, w1_ref, b1_ref, ..., o_ref)."""
    x_ref = refs[0]
    o_ref = refs[-1]
    wb_refs = refs[1:-1]

    # Straight-line unrolled layer chain; all intermediates stay in VMEM/vregs.
    h = x_ref[...].astype(jnp.float32)
    for layer in range(n_layers):
        w = wb_refs[2 * layer][...]          # bf16 (Din_p, Dout_p), MXU operand
        b = wb_refs[2 * layer + 1][...]      # fp32 (1, Dout_p)
        acc = jnp.dot(h.astype(jnp.bfloat16), w, preferred_element_type=jnp.float32)
        h = acc + b                          # fp32 epilogue (safe on v5e too)
        if layer != n_layers - 1:
            h = jnp.tanh(h)                  # EUP transcendental, fp32
    o_ref[...] = h.astype(o_ref.dtype)


def mpl_forward(params, x, *, block_b: int = 512):
    """Fused MLP forward: one pallas_call for the whole network.

    params: list of (w, b) with w:(Din_i, Dout_i), b:(1, Dout_i)  (fp32)
    x: (B, Din)
    """
    B, Din = x.shape
    n_layers = len(params)
    Dout = params[-1][0].shape[1]

    # ---- Lane-pad every feature width to a multiple of 128 --------------------
    widths = [Din] + [w.shape[1] for (w, _) in params]
    padded = [_round_up(d, _LANE) for d in widths]
    Din_p, Dout_p = padded[0], padded[-1]
    max_w = max(padded)

    padded_params = []
    for i, (w, b) in enumerate(params):
        din_p, dout_p = padded[i], padded[i + 1]
        w_p = jnp.zeros((din_p, dout_p), jnp.bfloat16)
        w_p = w_p.at[: w.shape[0], : w.shape[1]].set(w.astype(jnp.bfloat16))
        b_p = jnp.zeros((1, dout_p), jnp.float32)
        b_p = b_p.at[:, : b.shape[-1]].set(b.reshape(1, -1).astype(jnp.float32))
        padded_params.append((w_p, b_p))

    # ---- Batch tile selection --------------------------------------------------
    tb = min(block_b, _round_up(B, _SUBLANE))
    # Keep the live fp32 activation tile (tb x max_w x 4B) well under the 256 KiB
    # vreg file so the unrolled chain doesn't spill.
    tb_cap = max(_SUBLANE, ((128 * 1024) // (max_w * 4)) // _SUBLANE * _SUBLANE)
    tb = min(tb, tb_cap)
    # Give v7x's two TensorCores at least 2 parallel grid steps when batch permits.
    if _round_up(B, _SUBLANE) // tb < 2 and B >= 2 * _SUBLANE and tb > _SUBLANE:
        tb = max(_SUBLANE, _round_up(tb // 2, _SUBLANE))
    B_pad = _round_up(B, tb)
    grid = (B_pad // tb,)

    x_p = jnp.zeros((B_pad, Din_p), jnp.float32).at[:B, :Din].set(x.astype(jnp.float32))

    # ---- Explicit VMEM budget ---------------------------------------------------
    weight_bytes = sum(w_p.size * 2 + b_p.size * 4 for (w_p, b_p) in padded_params)
    io_bytes = 2 * tb * Din_p * 4 + 2 * tb * Dout_p * 4          # double-buffered x / out tiles
    act_bytes = 4 * tb * max_w * 4                               # live activations + headroom
    vmem_limit = min(48 << 20, max(16 << 20, int(1.5 * (weight_bytes + io_bytes + act_bytes))))

    kernel = functools.partial(_mpl_fused_kernel, n_layers=n_layers)

    def build_call(single_buffer_weights: bool):
        in_specs = [pl.BlockSpec((tb, Din_p), lambda i: (i, 0))]
        for (w_p, b_p) in padded_params:
            din_p, dout_p = w_p.shape
            if single_buffer_weights:
                # Grid-invariant -> no need to double-buffer; halves weight VMEM footprint.
                in_specs.append(pl.BlockSpec((din_p, dout_p), lambda i: (0, 0),
                                             pipeline_mode=pl.Buffered(1)))
                in_specs.append(pl.BlockSpec((1, dout_p), lambda i: (0, 0),
                                             pipeline_mode=pl.Buffered(1)))
            else:
                in_specs.append(pl.BlockSpec((din_p, dout_p), lambda i: (0, 0)))
                in_specs.append(pl.BlockSpec((1, dout_p), lambda i: (0, 0)))
        return pl.pallas_call(
            kernel,
            out_shape=jax.ShapeDtypeStruct((B_pad, Dout_p), x.dtype),
            grid_spec=pl.GridSpec(
                grid=grid,
                in_specs=in_specs,
                out_specs=pl.BlockSpec((tb, Dout_p), lambda i: (i, 0)),
            ),
            compiler_params=pltpu.CompilerParams(
                dimension_semantics=("parallel",),   # shards batch tiles across TCs on v7x
                vmem_limit_bytes=vmem_limit,
            ),
        )

    flat_args = [x_p]
    for (w_p, b_p) in padded_params:
        flat_args.append(w_p)
        flat_args.append(b_p)

    try:
        out_p = build_call(True)(*flat_args)
    except Exception:
        # Some jax versions reject Buffered(1); default double-buffering is identical
        # numerically and only costs extra VMEM for the (small) weights.
        out_p = build_call(False)(*flat_args)

    return out_p[:B, :Dout]


def init_mpl_params(key, input_size, hidden_size_list, output_size, dtype=jnp.float32):
    """Deterministic PyTorch-style (uniform +/- 1/sqrt(fan_in)) init."""
    params = []
    last = input_size
    sizes = list(hidden_size_list) + [output_size]
    for out in sizes:
        key, kw, kb = jax.random.split(key, 3)
        bound = 1.0 / float(jnp.sqrt(jnp.array(last, dtype=jnp.float32)))
        # stored as (in, out) so the kernel can do x @ W directly
        w = jax.random.uniform(kw, (last, out), dtype=dtype, minval=-bound, maxval=bound)
        b = jax.random.uniform(kb, (1, out), dtype=dtype, minval=-bound, maxval=bound)
        params.append((w, b))
        last = out
    return params


def mpl_forward_ref(params, x):
    """Pure-JAX fp32 reference matching MPL: (Linear -> Tanh)* then final Linear."""
    h = x
    n = len(params)
    for i, (w, b) in enumerate(params):
        h = h @ w + b
        if i != n - 1:
            h = jnp.tanh(h)
    return h


if __name__ == "__main__":
    input_size = 32
    hidden_size_list = [64, 48]
    output_size = 16

    key = jax.random.PRNGKey(0)
    params = init_mpl_params(key, input_size, hidden_size_list, output_size)

    # Small batch: single tile, grid=(1,).
    key, kx = jax.random.split(key)
    batch = 8
    x = jax.random.normal(kx, (batch, input_size), dtype=jnp.float32)
    out = jax.block_until_ready(mpl_forward(params, x))
    ref = mpl_forward_ref(params, x)
    assert out.shape == (batch, output_size)
    # bf16 MXU operands (fp32 accumulation) -> loosened tolerance vs fp32 reference.
    assert jnp.allclose(out, ref, atol=3e-2, rtol=3e-2), "mismatch vs reference (small batch)"

    # Ragged, multi-tile batch: exercises batch padding + parallel grid (>= 2 steps).
    key, kx2 = jax.random.split(key)
    batch2 = 300
    x2 = jax.random.normal(kx2, (batch2, input_size), dtype=jnp.float32)
    out2 = jax.block_until_ready(mpl_forward(params, x2, block_b=128))
    ref2 = mpl_forward_ref(params, x2)
    assert out2.shape == (batch2, output_size)
    assert jnp.allclose(out2, ref2, atol=3e-2, rtol=3e-2), "mismatch vs reference (ragged batch)"

    print("KERNEL_OK")
</pallas_src>

<mosaic_0001>
module attributes {stable_mosaic.version = 11 : i64} {
  func.func @_mpl_fused_kernel(%arg0: i32, %arg1: memref<8x128xf32, #tpu.memory_space<vmem>>, %arg2: memref<128x128xbf16, #tpu.memory_space<vmem>>, %arg3: memref<1x128xf32, #tpu.memory_space<vmem>>, %arg4: memref<128x128xbf16, #tpu.memory_space<vmem>>, %arg5: memref<1x128xf32, #tpu.memory_space<vmem>>, %arg6: memref<128x128xbf16, #tpu.memory_space<vmem>>, %arg7: memref<1x128xf32, #tpu.memory_space<vmem>>, %arg8: memref<8x128xf32, #tpu.memory_space<vmem>>) attributes {dimension_semantics = [#tpu.dimension_semantics<parallel>], iteration_bounds = array<i64: 1>, scalar_prefetch = 0 : i64, scratch_operands = 0 : i64, tpu.core_type = #tpu.core_type<tc>, window_params = [{transform_indices = @transform_0, window_bounds = array<i64: 8, 128>}, {pipeline_mode = #tpu.pipeline_mode<synchronous>, transform_indices = @transform_1, window_bounds = array<i64: 128, 128>}, {pipeline_mode = #tpu.pipeline_mode<synchronous>, transform_indices = @transform_2, window_bounds = array<i64: 1, 128>}, {pipeline_mode = #tpu.pipeline_mode<synchronous>, transform_indices = @transform_3, window_bounds = array<i64: 128, 128>}, {pipeline_mode = #tpu.pipeline_mode<synchronous>, transform_indices = @transform_4, window_bounds = array<i64: 1, 128>}, {pipeline_mode = #tpu.pipeline_mode<synchronous>, transform_indices = @transform_5, window_bounds = array<i64: 128, 128>}, {pipeline_mode = #tpu.pipeline_mode<synchronous>, transform_indices = @transform_6, window_bounds = array<i64: 1, 128>}, {transform_indices = @transform_7, window_bounds = array<i64: 8, 128>}]} {
    %c0 = arith.constant 0 : index
    %c0_0 = arith.constant 0 : index
    %0 = vector.load %arg1[%c0, %c0_0] : memref<8x128xf32, #tpu.memory_space<vmem>>, vector<8x128xf32>
    %c0_1 = arith.constant 0 : index
    %c0_2 = arith.constant 0 : index
    %1 = vector.load %arg2[%c0_1, %c0_2] : memref<128x128xbf16, #tpu.memory_space<vmem>>, vector<128x128xbf16>
    %c0_3 = arith.constant 0 : index
    %c0_4 = arith.constant 0 : index
    %2 = vector.load %arg3[%c0_3, %c0_4] : memref<1x128xf32, #tpu.memory_space<vmem>>, vector<1x128xf32>
    %3 = arith.truncf %0 : vector<8x128xf32> to vector<8x128xbf16>
    %cst = arith.constant dense<0.000000e+00> : vector<8x128xf32>
    %4 = tpu.matmul %3, %1, %cst {dimension_numbers = #tpu.dot_dimension_numbers<[1], [0], [0], [1], [0, 0, 1, 1], [], []>} : vector<8x128xbf16>, vector<128x128xbf16>, vector<8x128xf32> -> vector<8x128xf32>
    %5 = vector.broadcast %2 : vector<1x128xf32> to vector<8x128xf32>
    %6 = arith.addf %4, %5 : vector<8x128xf32>
    %7 = math.tanh %6 : vector<8x128xf32>
    %c0_5 = arith.constant 0 : index
    %c0_6 = arith.constant 0 : index
    %8 = vector.load %arg4[%c0_5, %c0_6] : memref<128x128xbf16, #tpu.memory_space<vmem>>, vector<128x128xbf16>
    %c0_7 = arith.constant 0 : index
    %c0_8 = arith.constant 0 : index
    %9 = vector.load %arg5[%c0_7, %c0_8] : memref<1x128xf32, #tpu.memory_space<vmem>>, vector<1x128xf32>
    %10 = arith.truncf %7 : vector<8x128xf32> to vector<8x128xbf16>
    %cst_9 = arith.constant dense<0.000000e+00> : vector<8x128xf32>
    %11 = tpu.matmul %10, %8, %cst_9 {dimension_numbers = #tpu.dot_dimension_numbers<[1], [0], [0], [1], [0, 0, 1, 1], [], []>} : vector<8x128xbf16>, vector<128x128xbf16>, vector<8x128xf32> -> vector<8x128xf32>
    %12 = vector.broadcast %9 : vector<1x128xf32> to vector<8x128xf32>
    %13 = arith.addf %11, %12 : vector<8x128xf32>
    %14 = math.tanh %13 : vector<8x128xf32>
    %c0_10 = arith.constant 0 : index
    %c0_11 = arith.constant 0 : index
    %15 = vector.load %arg6[%c0_10, %c0_11] : memref<128x128xbf16, #tpu.memory_space<vmem>>, vector<128x128xbf16>
    %c0_12 = arith.constant 0 : index
    %c0_13 = arith.constant 0 : index
    %16 = vector.load %arg7[%c0_12, %c0_13] : memref<1x128xf32, #tpu.memory_space<vmem>>, vector<1x128xf32>
    %17 = arith.truncf %14 : vector<8x128xf32> to vector<8x128xbf16>
    %cst_14 = arith.constant dense<0.000000e+00> : vector<8x128xf32>
    %18 = tpu.matmul %17, %15, %cst_14 {dimension_numbers = #tpu.dot_dimension_numbers<[1], [0], [0], [1], [0, 0, 1, 1], [], []>} : vector<8x128xbf16>, vector<128x128xbf16>, vector<8x128xf32> -> vector<8x128xf32>
    %19 = vector.broadcast %16 : vector<1x128xf32> to vector<8x128xf32>
    %20 = arith.addf %18, %19 : vector<8x128xf32>
    %c0_15 = arith.constant 0 : index
    %c0_16 = arith.constant 0 : index
    %21 = vector.load %arg8[%c0_15, %c0_16] : memref<8x128xf32, #tpu.memory_space<vmem>>, vector<8x128xf32>
    tpu.vector_store %arg8[%c0_15, %c0_16], %20 {strides = array<i32>} : memref<8x128xf32, #tpu.memory_space<vmem>>, vector<8x128xf32>,
    return
  }
  func.func @transform_0(%arg0: i32) -> (i32, i32) {
    %c0_i32 = arith.constant 0 : i32
    %c0_i32_0 = arith.constant 0 : i32
    return %arg0, %c0_i32 : i32, i32
  }
  func.func @transform_1(%arg0: i32) -> (i32, i32) {
    %c0_i32 = arith.constant 0 : i32
    %c0_i32_0 = arith.constant 0 : i32
    %c0_i32_1 = arith.constant 0 : i32
    return %c0_i32, %c0_i32_0 : i32, i32
  }
  func.func @transform_2(%arg0: i32) -> (i32, i32) {
    %c0_i32 = arith.constant 0 : i32
    %c0_i32_0 = arith.constant 0 : i32
    %c0_i32_1 = arith.constant 0 : i32
    return %c0_i32, %c0_i32_0 : i32, i32
  }
  func.func @transform_3(%arg0: i32) -> (i32, i32) {
    %c0_i32 = arith.constant 0 : i32
    %c0_i32_0 = arith.constant 0 : i32
    %c0_i32_1 = arith.constant 0 : i32
    return %c0_i32, %c0_i32_0 : i32, i32
  }
  func.func @transform_4(%arg0: i32) -> (i32, i32) {
    %c0_i32 = arith.constant 0 : i32
    %c0_i32_0 = arith.constant 0 : i32
    %c0_i32_1 = arith.constant 0 : i32
    return %c0_i32, %c0_i32_0 : i32, i32
  }
  func.func @transform_5(%arg0: i32) -> (i32, i32) {
    %c0_i32 = arith.constant 0 : i32
    %c0_i32_0 = arith.constant 0 : i32
    %c0_i32_1 = arith.constant 0 : i32
    return %c0_i32, %c0_i32_0 : i32, i32
  }
  func.func @transform_6(%arg0: i32) -> (i32, i32) {
    %c0_i32 = arith.constant 0 : i32
    %c0_i32_0 = arith.constant 0 : i32
    %c0_i32_1 = arith.constant 0 : i32
    return %c0_i32, %c0_i32_0 : i32, i32
  }
  func.func @transform_7(%arg0: i32) -> (i32, i32) {
    %c0_i32 = arith.constant 0 : i32
    %c0_i32_0 = arith.constant 0 : i32
    return %arg0, %c0_i32 : i32, i32
  }
}

module attributes {stable_mosaic.version = 11 : i64} {
  func.func @_mpl_fused_kernel(%arg0: i32, %arg1: memref<8x128xf32, #tpu.memory_space<vmem>>, %arg2: memref<128x128xbf16, #tpu.memory_space<vmem>>, %arg3: memref<1x128xf32, #tpu.memory_space<vmem>>, %arg4: memref<128x128xbf16, #tpu.memory_space<vmem>>, %arg5: memref<1x128xf32, #tpu.memory_space<vmem>>, %arg6: memref<128x128xbf16, #tpu.memory_space<vmem>>, %arg7: memref<1x128xf32, #tpu.memory_space<vmem>>, %arg8: memref<8x128xf32, #tpu.memory_space<vmem>>) attributes {dimension_semantics = [#tpu.dimension_semantics<parallel>], iteration_bounds = array<i64: 1>, scalar_prefetch = 0 : i64, scratch_operands = 0 : i64, tpu.core_type = #tpu.core_type<tc>, window_params = [{transform_indices = @transform_0, window_bounds = array<i64: 8, 128>}, {pipeline_mode = #tpu.pipeline_mode<synchronous>, transform_indices = @transform_1, window_bounds = array<i64: 128, 128>}, {pipeline_mode = #tpu.pipeline_mode<synchronous>, transform_indices = @transform_2, window_bounds = array<i64: 1, 128>}, {pipeline_mode = #tpu.pipeline_mode<synchronous>, transform_indices = @transform_3, window_bounds = array<i64: 128, 128>}, {pipeline_mode = #tpu.pipeline_mode<synchronous>, transform_indices = @transform_4, window_bounds = array<i64: 1, 128>}, {pipeline_mode = #tpu.pipeline_mode<synchronous>, transform_indices = @transform_5, window_bounds = array<i64: 128, 128>}, {pipeline_mode = #tpu.pipeline_mode<synchronous>, transform_indices = @transform_6, window_bounds = array<i64: 1, 128>}, {transform_indices = @transform_7, window_bounds = array<i64: 8, 128>}]} {
    %c0 = arith.constant 0 : index
    %c0_0 = arith.constant 0 : index
    %0 = vector.load %arg1[%c0, %c0_0] : memref<8x128xf32, #tpu.memory_space<vmem>>, vector<8x128xf32>
    %c0_1 = arith.constant 0 : index
    %c0_2 = arith.constant 0 : index
    %1 = vector.load %arg2[%c0_1, %c0_2] : memref<128x128xbf16, #tpu.memory_space<vmem>>, vector<128x128xbf16>
    %c0_3 = arith.constant 0 : index
    %c0_4 = arith.constant 0 : index
    %2 = vector.load %arg3[%c0_3, %c0_4] : memref<1x128xf32, #tpu.memory_space<vmem>>, vector<1x128xf32>
    %3 = arith.truncf %0 : vector<8x128xf32> to vector<8x128xbf16>
    %cst = arith.constant dense<0.000000e+00> : vector<8x128xf32>
    %4 = tpu.matmul %3, %1, %cst {dimension_numbers = #tpu.dot_dimension_numbers<[1], [0], [0], [1], [0, 0, 1, 1], [], []>} : vector<8x128xbf16>, vector<128x128xbf16>, vector<8x128xf32> -> vector<8x128xf32>
    %5 = vector.broadcast %2 : vector<1x128xf32> to vector<8x128xf32>
    %6 = arith.addf %4, %5 : vector<8x128xf32>
    %7 = math.tanh %6 : vector<8x128xf32>
    %c0_5 = arith.constant 0 : index
    %c0_6 = arith.constant 0 : index
    %8 = vector.load %arg4[%c0_5, %c0_6] : memref<128x128xbf16, #tpu.memory_space<vmem>>, vector<128x128xbf16>
    %c0_7 = arith.constant 0 : index
    %c0_8 = arith.constant 0 : index
    %9 = vector.load %arg5[%c0_7, %c0_8] : memref<1x128xf32, #tpu.memory_space<vmem>>, vector<1x128xf32>
    %10 = arith.truncf %7 : vector<8x128xf32> to vector<8x128xbf16>
    %cst_9 = arith.constant dense<0.000000e+00> : vector<8x128xf32>
    %11 = tpu.matmul %10, %8, %cst_9 {dimension_numbers = #tpu.dot_dimension_numbers<[1], [0], [0], [1], [0, 0, 1, 1], [], []>} : vector<8x128xbf16>, vector<128x128xbf16>, vector<8x128xf32> -> vector<8x128xf32>
    %12 = vector.broadcast %9 : vector<1x128xf32> to vector<8x128xf32>
    %13 = arith.addf %11, %12 : vector<8x128xf32>
    %14 = math.tanh %13 : vector<8x128xf32>
    %c0_10 = arith.constant 0 : index
    %c0_11 = arith.constant 0 : index
    %15 = vector.load %arg6[%c0_10, %c0_11] : memref<128x128xbf16, #tpu.memory_space<vmem>>, vector<128x128xbf16>
    %c0_12 = arith.constant 0 : index
    %c0_13 = arith.constant 0 : index
    %16 = vector.load %arg7[%c0_12, %c0_13] : memref<1x128xf32, #tpu.memory_space<vmem>>, vector<1x128xf32>
    %17 = arith.truncf %14 : vector<8x128xf32> to vector<8x128xbf16>
    %cst_14 = arith.constant dense<0.000000e+00> : vector<8x128xf32>
    %18 = tpu.matmul %17, %15, %cst_14 {dimension_numbers = #tpu.dot_dimension_numbers<[1], [0], [0], [1], [0, 0, 1, 1], [], []>} : vector<8x128xbf16>, vector<128x128xbf16>, vector<8x128xf32> -> vector<8x128xf32>
    %19 = vector.broadcast %16 : vector<1x128xf32> to vector<8x128xf32>
    %20 = arith.addf %18, %19 : vector<8x128xf32>
    %c0_15 = arith.constant 0 : index
    %c0_16 = arith.constant 0 : index
    %21 = vector.load %arg8[%c0_15, %c0_16] : memref<8x128xf32, #tpu.memory_space<vmem>>, vector<8x128xf32>
    tpu.vector_store %arg8[%c0_15, %c0_16], %20 {strides = array<i32>} : memref<8x128xf32, #tpu.memory_space<vmem>>, vector<8x128xf32>,
    return
  }
  func.func @transform_0(%arg0: i32) -> (i32, i32) {
    %c0_i32 = arith.constant 0 : i32
    %c0_i32_0 = arith.constant 0 : i32
    return %arg0, %c0_i32 : i32, i32
  }
  func.func @transform_1(%arg0: i32) -> (i32, i32) {
    %c0_i32 = arith.constant 0 : i32
    %c0_i32_0 = arith.constant 0 : i32
    %c0_i32_1 = arith.constant 0 : i32
    return %c0_i32, %c0_i32_0 : i32, i32
  }
  func.func @transform_2(%arg0: i32) -> (i32, i32) {
    %c0_i32 = arith.constant 0 : i32
    %c0_i32_0 = arith.constant 0 : i32
    %c0_i32_1 = arith.constant 0 : i32
    return %c0_i32, %c0_i32_0 : i32, i32
  }
  func.func @transform_3(%arg0: i32) -> (i32, i32) {
    %c0_i32 = arith.constant 0 : i32
    %c0_i32_0 = arith.constant 0 : i32
    %c0_i32_1 = arith.constant 0 : i32
    return %c0_i32, %c0_i32_0 : i32, i32
  }
  func.func @transform_4(%arg0: i32) -> (i32, i32) {
    %c0_i32 = arith.constant 0 : i32
    %c0_i32_0 = arith.constant 0 : i32
    %c0_i32_1 = arith.constant 0 : i32
    return %c0_i32, %c0_i32_0 : i32, i32
  }
  func.func @transform_5(%arg0: i32) -> (i32, i32) {
    %c0_i32 = arith.constant 0 : i32
    %c0_i32_0 = arith.constant 0 : i32
    %c0_i32_1 = arith.constant 0 : i32
    return %c0_i32, %c0_i32_0 : i32, i32
  }
  func.func @transform_6(%arg0: i32) -> (i32, i32) {
    %c0_i32 = arith.constant 0 : i32
    %c0_i32_0 = arith.constant 0 : i32
    %c0_i32_1 = arith.constant 0 : i32
    return %c0_i32, %c0_i32_0 : i32, i32
  }
  func.func @transform_7(%arg0: i32) -> (i32, i32) {
    %c0_i32 = arith.constant 0 : i32
    %c0_i32_0 = arith.constant 0 : i32
    return %arg0, %c0_i32 : i32, i32
  }
}

</mosaic_0001>

<bundles_post_ra>
// kernel: tpu_custom_call.1
= control target key start
LH: loop header
LB: loop body
LE: loop exit
PB: predicated region body
PF: predicated region fallthrough
CT: control target
= control target key end

     0   :  { %12 = vsyncpa [#allocation3], 0  ;;  %s690_s0 = inlined_call_operand.hbm [shape: f32[8,128], index: 0, kind: input, shape index: {}]   ;;  %s691_s1 = inlined_call_operand.hbm [shape: bf16[128,128], index: 1, kind: input, shape index: {}]   ;;  %s692_s2 = inlined_call_operand.vmem [shape: f32[1,128], index: 2, kind: input, shape index: {}]   ;;  %s693_s3 = inlined_call_operand.hbm [shape: bf16[128,128], index: 3, kind: input, shape index: {}]   ;;  %s694_s4 = inlined_call_operand.vmem [shape: f32[1,128], index: 4, kind: input, shape index: {}]   ;;  %s695_s5 = inlined_call_operand.hbm [shape: bf16[128,128], index: 5, kind: input, shape index: {}]   ;;  %s696_s6 = inlined_call_operand.vmem [shape: f32[1,128], index: 6, kind: input, shape index: {}]   ;;  %s697_s7 = inlined_call_operand.hbm [shape: f32[8,128], index: 7, kind: output, shape index: {}]  }
   0x1   :  { %13 = vsyncpa [#allocation6], 0 }
   0x2   :  { %14 = vsyncpa [#allocation9], 0  ;;  %s31_s26 = sshll.u32 %s691_s1, 4  ;;  %s32_s26 = int_to_ptr.hbm [resolvable:$true] %s31_s26 }
   0x3   :  { %15 = vsyncpa [#allocation4], 0  ;;  %s619_s27 = smov [#allocation5]   ;;  %s21_s8 = sshll.u32 %s690_s0, 4  ;;  %s22_s8 = int_to_ptr.hbm [resolvable:$true] %s21_s8 }
   0x4   :  { %s33_s28 = sshll.u32 %s619_s27, 4  ;;  %s620_s9 = smov 64   ;;  %s34_s28 = int_to_ptr.vmem [resolvable:$true] %s33_s28 }
   0x5   :  { %s621_s10 = smov 4   ;;  %s622_s11 = smov [#allocation2]  }
   0x6   :  { %39 = dma.hbm_to_vmem [thread:$0]  %s32_s26, 1024, %s34_s28, [#allocation6], %s620_s9, %s620_s9, %s621_s10  }
   0x7   :  { %s23_s12 = sshll.u32 %s622_s11, 4  ;;  %s46_s15 = sshll.u32 %s693_s3, 4  ;;  %s24_s12 = int_to_ptr.vmem [resolvable:$true] %s23_s12  ;;  %s47_s15 = int_to_ptr.hbm [resolvable:$true] %s46_s15 }
   0x8   :  { %26 = dma.hbm_to_vmem [thread:$0]  %s22_s8, 128, %s24_s12, [#allocation3]  }
   0x9   :  { %s61_s17 = sshll.u32 %s695_s5, 4  ;;  %s623_s18 = smov [#allocation7]   ;;  %s62_s17 = int_to_ptr.hbm [resolvable:$true] %s61_s17 }
   0xa   :  { %s48_s19 = sshll.u32 %s623_s18, 4  ;;  %s624_s0 = smov [#allocation8]   ;;  %s49_s19 = int_to_ptr.vmem [resolvable:$true] %s48_s19 }
   0xb   :  { %54 = dma.hbm_to_vmem [thread:$0]  %s47_s15, 1024, %s49_s19, [#allocation6], %s620_s9, %s620_s9, %s621_s10  }
   0xc   :  { %s63_s20 = sshll.u32 %s624_s0, 4  ;;  %s64_s20 = int_to_ptr.vmem [resolvable:$true] %s63_s20 }
   0xd   :  { %69 = dma.hbm_to_vmem [thread:$0]  %s62_s17, 1024, %s64_s20, [#allocation9], %s620_s9, %s620_s9, %s621_s10  }
   0xe   :  { %611 = dma.done.wait [#allocation3], 128  }
   0xf   :  { %612 = vsyncadd [#allocation3], 4294967168 }
  0x10   :  { %613 = dma.done.wait [#allocation6], 2048  }
  0x11   :  { %614 = vsyncadd [#allocation6], 4294965248 }
  0x12   :  { %615 = dma.done.wait [#allocation9], 1024  }
  0x13   :  { %616 = vsyncadd [#allocation9], 4294966272  ;;  %v460_v0 = vld [vmem:[#allocation5 + $0x38] sm:$0xff]  ;;  %v459_v1 = vld [vmem:[#allocation5 + $0x30] sm:$0xff]  ;;  %s625_s24 = smov [#allocation10]   ;;  %s345_s28 = sshll.u32 %s697_s7, 4  ;;  %s346_s28 = int_to_ptr.hbm [resolvable:$true] %s345_s28 }
  0x14   :  { %158 = vmatpush.bf16.msra.mxu0 %v460_v0  ;;  %v468_v2 = vld [vmem:[#allocation7 + $0x38] sm:$0xff]  ;;  %v467_v3 = vld [vmem:[#allocation7 + $0x30] sm:$0xff]  ;;  %v458_v4 = vld [vmem:[#allocation5 + $0x28] sm:$0xff]  ;;  %s343_s25 = sshll.u32 %s625_s24, 4  ;;  %s344_s25 = int_to_ptr.vmem [resolvable:$true] %s343_s25 }
  0x15   :  { %241 = vmatpush.bf16.msra.mxu1 %v468_v2  ;;  %v466_v5 = vld [vmem:[#allocation7 + $0x28] sm:$0xff]  ;;  %v457_v6 = vld [vmem:[#allocation5 + $0x20] sm:$0xff]  ;;  %v456_v8 = vld [vmem:[#allocation5 + $0x18] sm:$0xff] }
  0x16   :  { %v465_v7 = vld [vmem:[#allocation7 + $0x20] sm:$0xff]  ;;  %v464_v9 = vld [vmem:[#allocation7 + $0x18] sm:$0xff]  ;;  %v455_v10 = vld [vmem:[#allocation5 + $0x10] sm:$0xff] }
  0x17   :  { %v454_v11 = vld [vmem:[#allocation5 + $0x8] sm:$0xff]  ;;  %v453_v12 = vld [vmem:[#allocation5] sm:$0xff]  ;;  %v88_v13 = vld [vmem:[#allocation2] sm:$0xff] }
  0x18   :  { %159 = vmatpush.bf16.msra.mxu0 %v459_v1  ;;  %v106_v14 = vpack.c.bf16 %v88_v13, %v88_v13  ;;  %v463_v15 = vld [vmem:[#allocation7 + $0x10] sm:$0xff]  ;;  %v462_v16 = vld [vmem:[#allocation7 + $0x8] sm:$0xff]  ;;  %v461_v17 = vld [vmem:[#allocation7] sm:$0xff] }
  0x19   :  { %242 = vmatpush.bf16.msra.mxu1 %v467_v3  ;;  %v476_v18 = vld [vmem:[#allocation8 + $0x38] sm:$0xff]  ;;  %v475_v19 = vld [vmem:[#allocation8 + $0x30] sm:$0xff]  ;;  %v474_v20 = vld [vmem:[#allocation8 + $0x28] sm:$0xff] }
  0x1a   :  { %324 = vmatpush.bf16.msra.mxu2 %v476_v18  ;;  %v473_v21 = vld [vmem:[#allocation8 + $0x20] sm:$0xff]  ;;  %v472_v22 = vld [vmem:[#allocation8 + $0x18] sm:$0xff]  ;;  %v471_v29 = vld [vmem:[#allocation8 + $0x10] sm:$0xff] }
  0x1b   :  { %v484_v23 = vld [vmem:[%s692_s2] ss:$0 sm:$0xff]  ;;  %v470_v30 = vld [vmem:[#allocation8 + $0x8] sm:$0xff]  ;;  %v469_v31 = vld [vmem:[#allocation8] sm:$0xff] }
  0x1c   :  { %160 = vmatpush.bf16.msra.mxu0 %v458_v4  ;;  %v485_v32 = vld [vmem:[%s694_s4] ss:$0 sm:$0xff] }
  0x1d   :  { %243 = vmatpush.bf16.msra.mxu1 %v466_v5  ;;  %v486_v38 = vld [vmem:[%s696_s6] ss:$0 sm:$0xff] }
  0x1e   :  { %325 = vmatpush.bf16.msra.mxu2 %v475_v19 }
  0x20   :  { %161 = vmatpush.bf16.msra.mxu0 %v457_v6 }
  0x21   :  { %244 = vmatpush.bf16.msra.mxu1 %v465_v7 }
  0x22   :  { %326 = vmatpush.bf16.msra.mxu2 %v474_v20 }
  0x24   :  { %162 = vmatpush.bf16.msra.mxu0 %v456_v8 }
  0x25   :  { %245 = vmatpush.bf16.msra.mxu1 %v464_v9 }
  0x26   :  { %327 = vmatpush.bf16.msra.mxu2 %v473_v21 }
  0x28   :  { %163 = vmatpush.bf16.msra.mxu0 %v455_v10 }
  0x29   :  { %246 = vmatpush.bf16.msra.mxu1 %v463_v15 }
  0x2a   :  { %328 = vmatpush.bf16.msra.mxu2 %v472_v22 }
  0x2c   :  { %164 = vmatpush.bf16.msra.mxu0 %v454_v11 }
  0x2d   :  { %247 = vmatpush.bf16.msra.mxu1 %v462_v16 }
  0x2e   :  { %329 = vmatpush.bf16.msra.mxu2 %v471_v29 }
  0x30   :  { %165 = vmatpush.bf16.msra.mxu0 %v453_v12 }
  0x31   :  { %248 = vmatpush.bf16.msra.mxu1 %v461_v17 }
  0x32   :  { %330 = vmatpush.bf16.msra.mxu2 %v470_v30 }
  0x33   :  { %166 = vmatmul.bf16.vlgmr.msra.gmra.mxu0 %v106_v14 }
  0x36   :  { %331 = vmatpush.bf16.msra.mxu2 %v469_v31 }
  0xb0   :  { %v167_v24 = vpop.f32.mrf.mxu0 }
  0xb1   :  { %v168_v25 = vadd.f32 %v484_v23, %v167_v24 }
  0xb3   :  { %487 = vtanh.f32 %v168_v25 }
  0xb8   :  { %v169_v26 = vpop.f32.mrf.mxu0 }
  0xb9   :  { %v488_v27 = vpop.eup %487 }
  0xba   :  { %v189_v28 = vpack.c.bf16 %v488_v27, %v488_v27 }
  0xbc   :  { %249 = vmatmul.bf16.vlgmr.msra.gmra.mxu1 %v189_v28 }
 0x139   :  { %v250_v33 = vpop.f32.mrf.mxu1 }
 0x13a   :  { %v251_v34 = vadd.f32 %v485_v32, %v250_v33 }
 0x13c   :  { %489 = vtanh.f32 %v251_v34 }
 0x141   :  { %v252_v35 = vpop.f32.mrf.mxu1 }
 0x142   :  { %v490_v36 = vpop.eup %489 }
 0x143   :  { %v272_v37 = vpack.c.bf16 %v490_v36, %v490_v36 }
 0x145   :  { %332 = vmatmul.bf16.vlgmr.msra.gmra.mxu2 %v272_v37 }
 0x1c8   :  { %v333_v39 = vpop.f32.mrf.mxu2 }
 0x1c9   :  { %v334_v40 = vadd.f32 %v486_v38, %v333_v39 }
 0x1cb   :  { %337 = vst [vmem:[#allocation10] sm:$0xff] %v334_v40 }
 0x1cc   :  { %348 = dma.vmem_to_hbm [thread:$0]  %s344_s25, 128, %s346_s28, [#allocation4]  }
 0x1d0   :  { %v335_v41 = vpop.f32.mrf.mxu2 }
 0x1d1   :  { %617 = dma.done.wait [#allocation4], 128  }
 0x1d2   :  { %618 = vsyncadd [#allocation4], 4294967168 }
 0x1d3   :  { %353 = vsyncpa [#allocation3], 1 }
 0x1d4   :  { %354 = vsyncpa [#allocation6], 1 }
 0x1d5   :  { %355 = vsyncpa [#allocation9], 1 }
 0x1d6   :  { %356 = vsyncpa [#allocation4], 1 }

// kernel: tpu_custom_call.1
= control target key start
LH: loop header
LB: loop body
LE: loop exit
PB: predicated region body
PF: predicated region fallthrough
CT: control target
= control target key end

     0   :  { %12 = vsyncpa [#allocation3], 0  ;;  %s690_s0 = inlined_call_operand.hbm [shape: f32[8,128], index: 0, kind: input, shape index: {}]   ;;  %s691_s1 = inlined_call_operand.hbm [shape: bf16[128,128], index: 1, kind: input, shape index: {}]   ;;  %s692_s2 = inlined_call_operand.vmem [shape: f32[1,128], index: 2, kind: input, shape index: {}]   ;;  %s693_s3 = inlined_call_operand.hbm [shape: bf16[128,128], index: 3, kind: input, shape index: {}]   ;;  %s694_s4 = inlined_call_operand.vmem [shape: f32[1,128], index: 4, kind: input, shape index: {}]   ;;  %s695_s5 = inlined_call_operand.hbm [shape: bf16[128,128], index: 5, kind: input, shape index: {}]   ;;  %s696_s6 = inlined_call_operand.vmem [shape: f32[1,128], index: 6, kind: input, shape index: {}]   ;;  %s697_s7 = inlined_call_operand.hbm [shape: f32[8,128], index: 7, kind: output, shape index: {}]  }
   0x1   :  { %13 = vsyncpa [#allocation6], 0 }
   0x2   :  { %14 = vsyncpa [#allocation9], 0  ;;  %s31_s26 = sshll.u32 %s691_s1, 4  ;;  %s32_s26 = int_to_ptr.hbm [resolvable:$true] %s31_s26 }
   0x3   :  { %15 = vsyncpa [#allocation4], 0  ;;  %s619_s27 = smov [#allocation5]   ;;  %s21_s8 = sshll.u32 %s690_s0, 4  ;;  %s22_s8 = int_to_ptr.hbm [resolvable:$true] %s21_s8 }
   0x4   :  { %s33_s28 = sshll.u32 %s619_s27, 4  ;;  %s620_s9 = smov 64   ;;  %s34_s28 = int_to_ptr.vmem [resolvable:$true] %s33_s28 }
   0x5   :  { %s621_s10 = smov 4   ;;  %s622_s11 = smov [#allocation2]  }
   0x6   :  { %39 = dma.hbm_to_vmem [thread:$0]  %s32_s26, 1024, %s34_s28, [#allocation6], %s620_s9, %s620_s9, %s621_s10  }
   0x7   :  { %s23_s12 = sshll.u32 %s622_s11, 4  ;;  %s46_s15 = sshll.u32 %s693_s3, 4  ;;  %s24_s12 = int_to_ptr.vmem [resolvable:$true] %s23_s12  ;;  %s47_s15 = int_to_ptr.hbm [resolvable:$true] %s46_s15 }
   0x8   :  { %26 = dma.hbm_to_vmem [thread:$0]  %s22_s8, 128, %s24_s12, [#allocation3]  }
   0x9   :  { %s61_s17 = sshll.u32 %s695_s5, 4  ;;  %s623_s18 = smov [#allocation7]   ;;  %s62_s17 = int_to_ptr.hbm [resolvable:$true] %s61_s17 }
   0xa   :  { %s48_s19 = sshll.u32 %s623_s18, 4  ;;  %s624_s0 = smov [#allocation8]   ;;  %s49_s19 = int_to_ptr.vmem [resolvable:$true] %s48_s19 }
   0xb   :  { %54 = dma.hbm_to_vmem [thread:$0]  %s47_s15, 1024, %s49_s19, [#allocation6], %s620_s9, %s620_s9, %s621_s10  }
   0xc   :  { %s63_s20 = sshll.u32 %s624_s0, 4  ;;  %s64_s20 = int_to_ptr.vmem [resolvable:$true] %s63_s20 }
   0xd   :  { %69 = dma.hbm_to_vmem [thread:$0]  %s62_s17, 1024, %s64_s20, [#allocation9], %s620_s9, %s620_s9, %s621_s10  }
   0xe   :  { %611 = dma.done.wait [#allocation3], 128  }
   0xf   :  { %612 = vsyncadd [#allocation3], 4294967168 }
  0x10   :  { %613 = dma.done.wait [#allocation6], 2048  }
  0x11   :  { %614 = vsyncadd [#allocation6], 4294965248 }
  0x12   :  { %615 = dma.done.wait [#allocation9], 1024  }
  0x13   :  { %616 = vsyncadd [#allocation9], 4294966272  ;;  %v460_v0 = vld [vmem:[#allocation5 + $0x38] sm:$0xff]  ;;  %v459_v1 = vld [vmem:[#allocation5 + $0x30] sm:$0xff]  ;;  %s625_s24 = smov [#allocation10]   ;;  %s345_s28 = sshll.u32 %s697_s7, 4  ;;  %s346_s28 = int_to_ptr.hbm [resolvable:$true] %s345_s28 }
  0x14   :  { %158 = vmatpush.bf16.msra.mxu0 %v460_v0  ;;  %v468_v2 = vld [vmem:[#allocation7 + $0x38] sm:$0xff]  ;;  %v467_v3 = vld [vmem:[#allocation7 + $0x30] sm:$0xff]  ;;  %v458_v4 = vld [vmem:[#allocation5 + $0x28] sm:$0xff]  ;;  %s343_s25 = sshll.u32 %s625_s24, 4  ;;  %s344_s25 = int_to_ptr.vmem [resolvable:$true] %s343_s25 }
  0x15   :  { %241 = vmatpush.bf16.msra.mxu1 %v468_v2  ;;  %v466_v5 = vld [vmem:[#allocation7 + $0x28] sm:$0xff]  ;;  %v457_v6 = vld [vmem:[#allocation5 + $0x20] sm:$0xff]  ;;  %v456_v8 = vld [vmem:[#allocation5 + $0x18] sm:$0xff] }
  0x16   :  { %v465_v7 = vld [vmem:[#allocation7 + $0x20] sm:$0xff]  ;;  %v464_v9 = vld [vmem:[#allocation7 + $0x18] sm:$0xff]  ;;  %v455_v10 = vld [vmem:[#allocation5 + $0x10] sm:$0xff] }
  0x17   :  { %v454_v11 = vld [vmem:[#allocation5 + $0x8] sm:$0xff]  ;;  %v453_v12 = vld [vmem:[#allocation5] sm:$0xff]  ;;  %v88_v13 = vld [vmem:[#allocation2] sm:$0xff] }
  0x18   :  { %159 = vmatpush.bf16.msra.mxu0 %v459_v1  ;;  %v106_v14 = vpack.c.bf16 %v88_v13, %v88_v13  ;;  %v463_v15 = vld [vmem:[#allocation7 + $0x10] sm:$0xff]  ;;  %v462_v16 = vld [vmem:[#allocation7 + $0x8] sm:$0xff]  ;;  %v461_v17 = vld [vmem:[#allocation7] sm:$0xff] }
  0x19   :  { %242 = vmatpush.bf16.msra.mxu1 %v467_v3  ;;  %v476_v18 = vld [vmem:[#allocation8 + $0x38] sm:$0xff]  ;;  %v475_v19 = vld [vmem:[#allocation8 + $0x30] sm:$0xff]  ;;  %v474_v20 = vld [vmem:[#allocation8 + $0x28] sm:$0xff] }
  0x1a   :  { %324 = vmatpush.bf16.msra.mxu2 %v476_v18  ;;  %v473_v21 = vld [vmem:[#allocation8 + $0x20] sm:$0xff]  ;;  %v472_v22 = vld [vmem:[#allocation8 + $0x18] sm:$0xff]  ;;  %v471_v29 = vld [vmem:[#allocation8 + $0x10] sm:$0xff] }
  0x1b   :  { %v484_v23 = vld [vmem:[%s692_s2] ss:$0 sm:$0xff]  ;;  %v470_v30 = vld [vmem:[#allocation8 + $0x8] sm:$0xff]  ;;  %v469_v31 = vld [vmem:[#allocation8] sm:$0xff] }
  0x1c   :  { %160 = vmatpush.bf16.msra.mxu0 %v458_v4  ;;  %v485_v32 = vld [vmem:[%s694_s4] ss:$0 sm:$0xff] }
  0x1d   :  { %243 = vmatpush.bf16.msra.mxu1 %v466_v5  ;;  %v486_v38 = vld [vmem:[%s696_s6] ss:$0 sm:$0xff] }
  0x1e   :  { %325 = vmatpush.bf16.msra.mxu2 %v475_v19 }
  0x20   :  { %161 = vmatpush.bf16.msra.mxu0 %v457_v6 }
  0x21   :  { %244 = vmatpush.bf16.msra.mxu1 %v465_v7 }
  0x22   :  { %326 = vmatpush.bf16.msra.mxu2 %v474_v20 }
  0x24   :  { %162 = vmatpush.bf16.msra.mxu0 %v456_v8 }
  0x25   :  { %245 = vmatpush.bf16.msra.mxu1 %v464_v9 }
  0x26   :  { %327 = vmatpush.bf16.msra.mxu2 %v473_v21 }
  0x28   :  { %163 = vmatpush.bf16.msra.mxu0 %v455_v10 }
  0x29   :  { %246 = vmatpush.bf16.msra.mxu1 %v463_v15 }
  0x2a   :  { %328 = vmatpush.bf16.msra.mxu2 %v472_v22 }
  0x2c   :  { %164 = vmatpush.bf16.msra.mxu0 %v454_v11 }
  0x2d   :  { %247 = vmatpush.bf16.msra.mxu1 %v462_v16 }
  0x2e   :  { %329 = vmatpush.bf16.msra.mxu2 %v471_v29 }
  0x30   :  { %165 = vmatpush.bf16.msra.mxu0 %v453_v12 }
  0x31   :  { %248 = vmatpush.bf16.msra.mxu1 %v461_v17 }
  0x32   :  { %330 = vmatpush.bf16.msra.mxu2 %v470_v30 }
  0x33   :  { %166 = vmatmul.bf16.vlgmr.msra.gmra.mxu0 %v106_v14 }
  0x36   :  { %331 = vmatpush.bf16.msra.mxu2 %v469_v31 }
  0xb0   :  { %v167_v24 = vpop.f32.mrf.mxu0 }
  0xb1   :  { %v168_v25 = vadd.f32 %v484_v23, %v167_v24 }
  0xb3   :  { %487 = vtanh.f32 %v168_v25 }
  0xb8   :  { %v169_v26 = vpop.f32.mrf.mxu0 }
  0xb9   :  { %v488_v27 = vpop.eup %487 }
  0xba   :  { %v189_v28 = vpack.c.bf16 %v488_v27, %v488_v27 }
  0xbc   :  { %249 = vmatmul.bf16.vlgmr.msra.gmra.mxu1 %v189_v28 }
 0x139   :  { %v250_v33 = vpop.f32.mrf.mxu1 }
 0x13a   :  { %v251_v34 = vadd.f32 %v485_v32, %v250_v33 }
 0x13c   :  { %489 = vtanh.f32 %v251_v34 }
 0x141   :  { %v252_v35 = vpop.f32.mrf.mxu1 }
 0x142   :  { %v490_v36 = vpop.eup %489 }
 0x143   :  { %v272_v37 = vpack.c.bf16 %v490_v36, %v490_v36 }
 0x145   :  { %332 = vmatmul.bf16.vlgmr.msra.gmra.mxu2 %v272_v37 }
 0x1c8   :  { %v333_v39 = vpop.f32.mrf.mxu2 }
 0x1c9   :  { %v334_v40 = vadd.f32 %v486_v38, %v333_v39 }
 0x1cb   :  { %337 = vst [vmem:[#allocation10] sm:$0xff] %v334_v40 }
 0x1cc   :  { %348 = dma.vmem_to_hbm [thread:$0]  %s344_s25, 128, %s346_s28, [#allocation4]  }
 0x1d0   :  { %v335_v41 = vpop.f32.mrf.mxu2 }
 0x1d1   :  { %617 = dma.done.wait [#allocation4], 128  }
 0x1d2   :  { %618 = vsyncadd [#allocation4], 4294967168 }
 0x1d3   :  { %353 = vsyncpa [#allocation3], 1 }
 0x1d4   :  { %354 = vsyncpa [#allocation6], 1 }
 0x1d5   :  { %355 = vsyncpa [#allocation9], 1 }
 0x1d6   :  { %356 = vsyncpa [#allocation4], 1 }

</bundles_post_ra>
